<compile_context>
chip_gen: v5e
topology: v5e:2x2
jax: 0.10.0
libtpu: 0.0.40
codegen_flags: <defaults>
</compile_context>

<pallas_src>
import functools
import math

import jax
import jax.numpy as jnp
from jax import lax
from jax.experimental import pallas as pl
from jax.experimental.pallas import tpu as pltpu


def _ntxent_kernel(pos_ref, smp_ref, negd_ref, neg_ref, out_ref,
                   smp_sc, pos_sc, den_sc, *, inv_t, n_col_pad):
    """Grid = (num_i_tiles, num_j_tiles); j is the reduction axis.

    pos_ref, smp_ref, negd_ref : [tq, D] tiles (i-indexed; negd = neg rows i)
    neg_ref                    : [tk, D] tile  (j-indexed)
    out_ref                    : [tq, 1] per-row loss, written at j == last
    smp_sc [tq, D], pos_sc [tq, 1], den_sc [tq, 1] : VMEM scratch
    """
    j = pl.program_id(1)
    nj = pl.num_programs(1)

    def _inv_norm(x):
        ss = jnp.sum(x * x, axis=-1, keepdims=True)
        # == 1 / max(||x||, 1e-8); rsqrt runs on the EUP slot.
        return lax.rsqrt(jnp.maximum(ss, 1e-16))

    @pl.when(j == 0)
    def _init():
        smp = smp_ref[...].astype(jnp.float32)
        pos = pos_ref[...].astype(jnp.float32)
        negd = negd_ref[...].astype(jnp.float32)

        # Normalize sample rows and fold 1/temperature into them so the MXU
        # output is already the exp argument.
        smp_s = smp * (_inv_norm(smp) * inv_t)
        smp_sc[...] = smp_s
        # Positive logit: cos(pos_i, sample_i) / T
        pos_sc[...] = jnp.sum(pos * _inv_norm(pos) * smp_s, axis=-1,
                              keepdims=True)
        # Running denominator.  Start at -(diagonal term + contribution of the
        # zero-padded neg columns, each of which adds exp(0) == 1).
        diag = jnp.exp(jnp.sum(negd * _inv_norm(negd) * smp_s, axis=-1,
                               keepdims=True))
        den_sc[...] = -(diag + n_col_pad)

    # Hot path: [tq, tk] logits straight off the MXU, exp on the EUP, row-sum.
    neg = neg_ref[...].astype(jnp.float32)
    neg_n = neg * _inv_norm(neg)
    logits = lax.dot_general(
        smp_sc[...], neg_n,
        dimension_numbers=(((1,), (1,)), ((), ())),   # contract D of both
        preferred_element_type=jnp.float32)
    den_sc[...] += jnp.sum(jnp.exp(logits), axis=-1, keepdims=True)

    @pl.when(j == nj - 1)
    def _finalize():
        # -log10(exp(pos)/denom) = (ln(denom) - pos) / ln(10)
        out_ref[...] = (jnp.log(den_sc[...]) - pos_sc[...]) * (1.0 / math.log(10.0))


def _round_up(x, m):
    return ((x + m - 1) // m) * m


def ntxent_loss_pallas(pos, sample, neg, temperature, *, block_q=128, block_k=512):
    """pos, sample, neg: [N, D] arrays. Returns scalar f32 loss."""
    assert pos.shape == sample.shape == neg.shape and pos.ndim == 2
    assert block_q % 8 == 0
    n, d = sample.shape
    if n < 2:
        raise ValueError("NT-Xent needs at least 2 pairs (empty denominator otherwise).")

    # Tile / padding selection: rows padded to a multiple of the row tiles.
    base = _round_up(n, 8)
    if base <= block_q:
        tq = tk = n_pad = base
    else:
        tq = block_q
        n_pad = _round_up(n, tq)
        g = math.gcd(n_pad // tq, max(1, block_k // tq))
        tk = tq * g

    pad = n_pad - n
    if pad:
        padf = lambda x: jnp.pad(x, ((0, pad), (0, 0)))
        pos, sample, neg = padf(pos), padf(sample), padf(neg)

    kernel = functools.partial(
        _ntxent_kernel,
        inv_t=1.0 / float(temperature),
        n_col_pad=float(pad),   # zero-padded neg columns each add exp(0) = 1
    )

    per_row = pl.pallas_call(
        kernel,
        out_shape=jax.ShapeDtypeStruct((n_pad, 1), jnp.float32),
        grid=(n_pad // tq, n_pad // tk),
        in_specs=[
            pl.BlockSpec((tq, d), lambda i, j: (i, 0)),   # pos        (i-tile)
            pl.BlockSpec((tq, d), lambda i, j: (i, 0)),   # sample     (i-tile)
            pl.BlockSpec((tq, d), lambda i, j: (i, 0)),   # neg (diag) (i-tile)
            pl.BlockSpec((tk, d), lambda i, j: (j, 0)),   # neg        (j-tile)
        ],
        out_specs=pl.BlockSpec((tq, 1), lambda i, j: (i, 0)),
        scratch_shapes=[
            pltpu.VMEM((tq, d), jnp.float32),   # normalized+scaled sample tile
            pltpu.VMEM((tq, 1), jnp.float32),   # positive logits
            pltpu.VMEM((tq, 1), jnp.float32),   # running denominator
        ],
        compiler_params=pltpu.CompilerParams(
            dimension_semantics=("parallel", "arbitrary")),
    )(pos, sample, neg, neg)

    # Final mean over the real (unpadded) rows.
    return jnp.sum(per_row[:n, 0]) / n


def _ntxent_loss_ref(pos, sample, neg, temperature):
    """Pure-JAX reference mirroring the PyTorch loops."""
    eps = 1e-8

    def _normalize(x):
        nrm = jnp.sqrt(jnp.sum(x * x, axis=-1, keepdims=True))
        return x / jnp.maximum(nrm, eps)

    pos_n, smp_n, neg_n = _normalize(pos), _normalize(sample), _normalize(neg)
    pos_sim = jnp.sum(pos_n * smp_n, axis=-1)          # [N]
    neg_sim = smp_n @ neg_n.T                          # [N, N]
    exp_neg = jnp.exp(neg_sim / temperature)
    n = pos.shape[0]
    mask = ~jnp.eye(n, dtype=bool)
    denom = jnp.sum(jnp.where(mask, exp_neg, 0.0), axis=-1)
    loss_i = -(pos_sim / temperature - jnp.log(denom)) / math.log(10.0)
    return jnp.mean(loss_i)


if __name__ == "__main__":
    temperature = 0.5
    key = jax.random.PRNGKey(0)
    k1, k2, k3, k4, k5, k6 = jax.random.split(key, 6)

    # Case 1: small shapes consistent with the module (N pairs of D-dim embeddings).
    N, D = 8, 32
    pos = jax.random.normal(k1, (N, D), dtype=jnp.float32)
    sample = jax.random.normal(k2, (N, D), dtype=jnp.float32)
    neg = jax.random.normal(k3, (N, D), dtype=jnp.float32)

    loss = ntxent_loss_pallas(pos, sample, neg, temperature)
    jax.block_until_ready(loss)
    ref = _ntxent_loss_ref(pos, sample, neg, temperature)
    assert jnp.isfinite(loss), "non-finite loss"
    assert jnp.allclose(loss, ref, rtol=1e-4, atol=1e-4), (loss, ref)

    # Case 2: exercise the multi-(i, j)-tile path, row padding and the
    # diagonal / padded-column corrections (tiny tiles on purpose).
    N2, D2 = 20, 32
    pos2 = jax.random.normal(k4, (N2, D2), dtype=jnp.float32)
    sample2 = jax.random.normal(k5, (N2, D2), dtype=jnp.float32)
    neg2 = jax.random.normal(k6, (N2, D2), dtype=jnp.float32)

    loss2 = ntxent_loss_pallas(pos2, sample2, neg2, temperature,
                               block_q=8, block_k=8)
    jax.block_until_ready(loss2)
    ref2 = _ntxent_loss_ref(pos2, sample2, neg2, temperature)
    assert jnp.isfinite(loss2), "non-finite loss (tiled case)"
    assert jnp.allclose(loss2, ref2, rtol=1e-4, atol=1e-4), (loss2, ref2)

    print("KERNEL_OK")
</pallas_src>

<mosaic_0001>
module attributes {stable_mosaic.version = 11 : i64} {
  func.func @_ntxent_kernel(%arg0: i32, %arg1: i32, %arg2: memref<8x32xf32, #tpu.memory_space<vmem>>, %arg3: memref<8x32xf32, #tpu.memory_space<vmem>>, %arg4: memref<8x32xf32, #tpu.memory_space<vmem>>, %arg5: memref<8x32xf32, #tpu.memory_space<vmem>>, %arg6: memref<8x1xf32, #tpu.memory_space<vmem>>, %arg7: memref<8x32xf32, #tpu.memory_space<vmem>>, %arg8: memref<8x1xf32, #tpu.memory_space<vmem>>, %arg9: memref<8x1xf32, #tpu.memory_space<vmem>>) attributes {dimension_semantics = [#tpu.dimension_semantics<parallel>, #tpu.dimension_semantics<arbitrary>], iteration_bounds = array<i64: 1, 1>, scalar_prefetch = 0 : i64, scratch_operands = 3 : i64, tpu.core_type = #tpu.core_type<tc>, window_params = [{transform_indices = @transform_0, window_bounds = array<i64: 8, 32>}, {transform_indices = @transform_1, window_bounds = array<i64: 8, 32>}, {transform_indices = @transform_2, window_bounds = array<i64: 8, 32>}, {transform_indices = @transform_3, window_bounds = array<i64: 8, 32>}, {transform_indices = @transform_4, window_bounds = array<i64: 8, 1>}]} {
    %c0_i32 = arith.constant 0 : i32
    %0 = arith.cmpi eq, %arg1, %c0_i32 : i32
    %1 = arith.extui %0 : i1 to i32
    %c0_i32_0 = arith.constant 0 : i32
    %2 = arith.cmpi ne, %1, %c0_i32_0 : i32
    scf.if %2 {
      %c0_13 = arith.constant 0 : index
      %c0_14 = arith.constant 0 : index
      %23 = vector.load %arg3[%c0_13, %c0_14] : memref<8x32xf32, #tpu.memory_space<vmem>>, vector<8x32xf32>
      %c0_15 = arith.constant 0 : index
      %c0_16 = arith.constant 0 : index
      %24 = vector.load %arg2[%c0_15, %c0_16] : memref<8x32xf32, #tpu.memory_space<vmem>>, vector<8x32xf32>
      %c0_17 = arith.constant 0 : index
      %c0_18 = arith.constant 0 : index
      %25 = vector.load %arg4[%c0_17, %c0_18] : memref<8x32xf32, #tpu.memory_space<vmem>>, vector<8x32xf32>
      %26 = arith.mulf %23, %23 : vector<8x32xf32>
      %cst_19 = arith.constant dense<0.000000e+00> : vector<8xf32>
      %27 = vector.multi_reduction <add>, %26, %cst_19 [1] : vector<8x32xf32> to vector<8xf32>
      %28 = vector.shape_cast %27 : vector<8xf32> to vector<8x1xf32>
      %cst_20 = arith.constant 1.000000e-16 : f32
      %29 = vector.broadcast %cst_20 : f32 to vector<8x1xf32>
      %30 = arith.maximumf %28, %29 : vector<8x1xf32>
      %31 = math.rsqrt %30 : vector<8x1xf32>
      %cst_21 = arith.constant 2.000000e+00 : f32
      %32 = vector.broadcast %cst_21 : f32 to vector<8x1xf32>
      %33 = arith.mulf %31, %32 : vector<8x1xf32>
      %34 = vector.broadcast %33 : vector<8x1xf32> to vector<8x32xf32>
      %35 = arith.mulf %23, %34 : vector<8x32xf32>
      %c0_22 = arith.constant 0 : index
      %c0_23 = arith.constant 0 : index
      %36 = vector.load %arg7[%c0_22, %c0_23] : memref<8x32xf32, #tpu.memory_space<vmem>>, vector<8x32xf32>
      tpu.vector_store %arg7[%c0_22, %c0_23], %35 {strides = array<i32>} : memref<8x32xf32, #tpu.memory_space<vmem>>, vector<8x32xf32>,
      %37 = arith.mulf %24, %24 : vector<8x32xf32>
      %cst_24 = arith.constant dense<0.000000e+00> : vector<8xf32>
      %38 = vector.multi_reduction <add>, %37, %cst_24 [1] : vector<8x32xf32> to vector<8xf32>
      %39 = vector.shape_cast %38 : vector<8xf32> to vector<8x1xf32>
      %cst_25 = arith.constant 1.000000e-16 : f32
      %40 = vector.broadcast %cst_25 : f32 to vector<8x1xf32>
      %41 = arith.maximumf %39, %40 : vector<8x1xf32>
      %42 = math.rsqrt %41 : vector<8x1xf32>
      %43 = vector.broadcast %42 : vector<8x1xf32> to vector<8x32xf32>
      %44 = arith.mulf %24, %43 : vector<8x32xf32>
      %45 = arith.mulf %44, %35 : vector<8x32xf32>
      %cst_26 = arith.constant dense<0.000000e+00> : vector<8xf32>
      %46 = vector.multi_reduction <add>, %45, %cst_26 [1] : vector<8x32xf32> to vector<8xf32>
      %47 = vector.shape_cast %46 : vector<8xf32> to vector<8x1xf32>
      %c0_27 = arith.constant 0 : index
      %c0_28 = arith.constant 0 : index
      %48 = vector.load %arg8[%c0_27, %c0_28] : memref<8x1xf32, #tpu.memory_space<vmem>>, vector<8x1xf32>
      tpu.vector_store %arg8[%c0_27, %c0_28], %47 {strides = array<i32>} : memref<8x1xf32, #tpu.memory_space<vmem>>, vector<8x1xf32>,
      %49 = arith.mulf %25, %25 : vector<8x32xf32>
      %cst_29 = arith.constant dense<0.000000e+00> : vector<8xf32>
      %50 = vector.multi_reduction <add>, %49, %cst_29 [1] : vector<8x32xf32> to vector<8xf32>
      %51 = vector.shape_cast %50 : vector<8xf32> to vector<8x1xf32>
      %cst_30 = arith.constant 1.000000e-16 : f32
      %52 = vector.broadcast %cst_30 : f32 to vector<8x1xf32>
      %53 = arith.maximumf %51, %52 : vector<8x1xf32>
      %54 = math.rsqrt %53 : vector<8x1xf32>
      %55 = vector.broadcast %54 : vector<8x1xf32> to vector<8x32xf32>
      %56 = arith.mulf %25, %55 : vector<8x32xf32>
      %57 = arith.mulf %56, %35 : vector<8x32xf32>
      %cst_31 = arith.constant dense<0.000000e+00> : vector<8xf32>
      %58 = vector.multi_reduction <add>, %57, %cst_31 [1] : vector<8x32xf32> to vector<8xf32>
      %59 = vector.shape_cast %58 : vector<8xf32> to vector<8x1xf32>
      %60 = math.exp %59 : vector<8x1xf32>
      %cst_32 = arith.constant 0.000000e+00 : f32
      %61 = vector.broadcast %cst_32 : f32 to vector<8x1xf32>
      %62 = arith.addf %60, %61 : vector<8x1xf32>
      %cst_33 = arith.constant 0.000000e+00 : f32
      %63 = vector.broadcast %cst_33 : f32 to vector<8x1xf32>
      %64 = arith.subf %63, %62 : vector<8x1xf32>
      %c0_34 = arith.constant 0 : index
      %c0_35 = arith.constant 0 : index
      %65 = vector.load %arg9[%c0_34, %c0_35] : memref<8x1xf32, #tpu.memory_space<vmem>>, vector<8x1xf32>
      tpu.vector_store %arg9[%c0_34, %c0_35], %64 {strides = array<i32>} : memref<8x1xf32, #tpu.memory_space<vmem>>, vector<8x1xf32>,
    } else {
    }
    %c0 = arith.constant 0 : index
    %c0_1 = arith.constant 0 : index
    %3 = vector.load %arg5[%c0, %c0_1] : memref<8x32xf32, #tpu.memory_space<vmem>>, vector<8x32xf32>
    %4 = arith.mulf %3, %3 : vector<8x32xf32>
    %cst = arith.constant dense<0.000000e+00> : vector<8xf32>
    %5 = vector.multi_reduction <add>, %4, %cst [1] : vector<8x32xf32> to vector<8xf32>
    %6 = vector.shape_cast %5 : vector<8xf32> to vector<8x1xf32>
    %cst_2 = arith.constant 1.000000e-16 : f32
    %7 = vector.broadcast %cst_2 : f32 to vector<8x1xf32>
    %8 = arith.maximumf %6, %7 : vector<8x1xf32>
    %9 = math.rsqrt %8 : vector<8x1xf32>
    %10 = vector.broadcast %9 : vector<8x1xf32> to vector<8x32xf32>
    %11 = arith.mulf %3, %10 : vector<8x32xf32>
    %c0_3 = arith.constant 0 : index
    %c0_4 = arith.constant 0 : index
    %12 = vector.load %arg7[%c0_3, %c0_4] : memref<8x32xf32, #tpu.memory_space<vmem>>, vector<8x32xf32>
    %cst_5 = arith.constant dense<0.000000e+00> : vector<8x8xf32>
    %13 = tpu.matmul %12, %11, %cst_5 {dimension_numbers = #tpu.dot_dimension_numbers<[1], [1], [0], [0], [0, 0, 1, 0], [], []>} : vector<8x32xf32>, vector<8x32xf32>, vector<8x8xf32> -> vector<8x8xf32>
    %c0_6 = arith.constant 0 : index
    %c0_7 = arith.constant 0 : index
    %14 = vector.load %arg9[%c0_6, %c0_7] : memref<8x1xf32, #tpu.memory_space<vmem>>, vector<8x1xf32>
    %15 = math.exp %13 : vector<8x8xf32>
    %cst_8 = arith.constant dense<0.000000e+00> : vector<8xf32>
    %16 = vector.multi_reduction <add>, %15, %cst_8 [1] : vector<8x8xf32> to vector<8xf32>
    %17 = vector.shape_cast %16 : vector<8xf32> to vector<8x1xf32>
    %18 = arith.addf %14, %17 : vector<8x1xf32>
    %c0_9 = arith.constant 0 : index
    %c0_10 = arith.constant 0 : index
    %19 = vector.load %arg9[%c0_9, %c0_10] : memref<8x1xf32, #tpu.memory_space<vmem>>, vector<8x1xf32>
    tpu.vector_store %arg9[%c0_9, %c0_10], %18 {strides = array<i32>} : memref<8x1xf32, #tpu.memory_space<vmem>>, vector<8x1xf32>,
    %c0_i32_11 = arith.constant 0 : i32
    %20 = arith.cmpi eq, %arg1, %c0_i32_11 : i32
    %21 = arith.extui %20 : i1 to i32
    %c0_i32_12 = arith.constant 0 : i32
    %22 = arith.cmpi ne, %21, %c0_i32_12 : i32
    scf.if %22 {
      %c0_13 = arith.constant 0 : index
      %c0_14 = arith.constant 0 : index
      %23 = vector.load %arg9[%c0_13, %c0_14] : memref<8x1xf32, #tpu.memory_space<vmem>>, vector<8x1xf32>
      %24 = math.log %23 : vector<8x1xf32>
      %c0_15 = arith.constant 0 : index
      %c0_16 = arith.constant 0 : index
      %25 = vector.load %arg8[%c0_15, %c0_16] : memref<8x1xf32, #tpu.memory_space<vmem>>, vector<8x1xf32>
      %26 = arith.subf %24, %25 : vector<8x1xf32>
      %cst_17 = arith.constant 0.434294492 : f32
      %27 = vector.broadcast %cst_17 : f32 to vector<8x1xf32>
      %28 = arith.mulf %26, %27 : vector<8x1xf32>
      %c0_18 = arith.constant 0 : index
      %c0_19 = arith.constant 0 : index
      %29 = vector.load %arg6[%c0_18, %c0_19] : memref<8x1xf32, #tpu.memory_space<vmem>>, vector<8x1xf32>
      tpu.vector_store %arg6[%c0_18, %c0_19], %28 {strides = array<i32>} : memref<8x1xf32, #tpu.memory_space<vmem>>, vector<8x1xf32>,
    } else {
    }
    return
  }
  func.func @transform_0(%arg0: i32, %arg1: i32) -> (i32, i32) {
    %c0_i32 = arith.constant 0 : i32
    %c0_i32_0 = arith.constant 0 : i32
    return %arg0, %c0_i32 : i32, i32
  }
  func.func @transform_1(%arg0: i32, %arg1: i32) -> (i32, i32) {
    %c0_i32 = arith.constant 0 : i32
    %c0_i32_0 = arith.constant 0 : i32
    return %arg0, %c0_i32 : i32, i32
  }
  func.func @transform_2(%arg0: i32, %arg1: i32) -> (i32, i32) {
    %c0_i32 = arith.constant 0 : i32
    %c0_i32_0 = arith.constant 0 : i32
    return %arg0, %c0_i32 : i32, i32
  }
  func.func @transform_3(%arg0: i32, %arg1: i32) -> (i32, i32) {
    %c0_i32 = arith.constant 0 : i32
    %c0_i32_0 = arith.constant 0 : i32
    return %arg1, %c0_i32 : i32, i32
  }
  func.func @transform_4(%arg0: i32, %arg1: i32) -> (i32, i32) {
    %c0_i32 = arith.constant 0 : i32
    %c0_i32_0 = arith.constant 0 : i32
    return %arg0, %c0_i32 : i32, i32
  }
}

</mosaic_0001>

<bundles_post_ra>
// kernel: tpu_custom_call.1
= control target key start
LH: loop header
LB: loop body
LE: loop exit
PB: predicated region body
PF: predicated region fallthrough
CT: control target
= control target key end

     0   :  { %9 = vsyncpa [#allocation6], 0  ;;  %s412_s0 = inlined_call_operand.hbm [shape: f32[8,32], index: 0, kind: input, shape index: {}]   ;;  %s413_s1 = inlined_call_operand.hbm [shape: f32[8,32], index: 1, kind: input, shape index: {}]   ;;  %s414_s2 = inlined_call_operand.hbm [shape: f32[8,32], index: 2, kind: input, shape index: {}]   ;;  %s415_s3 = inlined_call_operand.hbm [shape: f32[8,32], index: 3, kind: input, shape index: {}]   ;;  %s416_s4 = inlined_call_operand.vmem [shape: f32[8,1], index: 4, kind: output, shape index: {}]  }
   0x1   :  { %10 = vsyncpa [#allocation8], 0  ;;  %s28_s17 = sshll.u32 %s413_s1, 4  ;;  %s29_s17 = int_to_ptr.hbm [resolvable:$true] %s28_s17 }
   0x2   :  { %11 = vsyncpa [#allocation11], 0  ;;  %s339_s18 = smov [#allocation7]   ;;  %s17_s22 = sshll.u32 %s412_s0, 4  ;;  %s18_s22 = int_to_ptr.hbm [resolvable:$true] %s17_s22 }
   0x3   :  { %s30_s19 = sshll.u32 %s339_s18, 4  ;;  %s340_s23 = smov [#allocation5]   ;;  %s31_s19 = int_to_ptr.vmem [resolvable:$true] %s30_s19 }
   0x4   :  { %33 = dma.hbm_to_vmem [thread:$0]  %s29_s17, 128, %s31_s19, [#allocation8]  }
   0x5   :  { %s19_s24 = sshll.u32 %s340_s23, 4  ;;  %s39_s27 = sshll.u32 %s414_s2, 4  ;;  %s20_s24 = int_to_ptr.vmem [resolvable:$true] %s19_s24  ;;  %s40_s27 = int_to_ptr.hbm [resolvable:$true] %s39_s27 }
   0x6   :  { %22 = dma.hbm_to_vmem [thread:$0]  %s18_s22, 128, %s20_s24, [#allocation6]  }
   0x7   :  { %s50_s29 = sshll.u32 %s415_s3, 4  ;;  %s341_s30 = smov [#allocation9]   ;;  %s51_s29 = int_to_ptr.hbm [resolvable:$true] %s50_s29 }
   0x8   :  { %s41_s5 = sshll.u32 %s341_s30, 4  ;;  %s342_s0 = smov [#allocation10]   ;;  %s42_s5 = int_to_ptr.vmem [resolvable:$true] %s41_s5 }
   0x9   :  { %44 = dma.hbm_to_vmem [thread:$0]  %s40_s27, 128, %s42_s5, [#allocation8]  }
   0xa   :  { %s52_s6 = sshll.u32 %s342_s0, 4  ;;  %s53_s6 = int_to_ptr.vmem [resolvable:$true] %s52_s6 }
   0xb   :  { %55 = dma.hbm_to_vmem [thread:$0]  %s51_s29, 128, %s53_s6, [#allocation11]  }
   0xc   :  { %333 = dma.done.wait [#allocation6], 128  }
   0xd   :  { %334 = vsyncadd [#allocation6], 4294967168 }
   0xe   :  { %335 = dma.done.wait [#allocation8], 256  }
   0xf   :  { %336 = vsyncadd [#allocation8], 4294967040 }
  0x10   :  { %337 = dma.done.wait [#allocation11], 128  }
  0x11   :  { %338 = vsyncadd [#allocation11], 4294967168  ;;  %v78_v0 = vld [vmem:[#allocation9] sm:$0xff]  ;;  %vm80_vm0 = vcmask 261120   ;;  %v76_v1 = vld [vmem:[#allocation7] sm:$0xff]  ;;  %vm118_vm13 = vcmask 7168  }
  0x12   :  { %v120_v2 = vmul.f32 %v78_v0, %v78_v0  ;;  %v79_v3 = vmul.f32 %v76_v1, %v76_v1  ;;  %v380_v4 = vld [vmem:[#allocation5] sm:$0xff]  ;;  %v382_v5 = vld [vmem:[#allocation10] sm:$0xff]  ;;  %vm193_vm14 = vcmask 64512  }
  0x13   :  { %v98_v8 = vmul.f32 %v380_v4, %v380_v4  ;;  %v146_v9 = vmul.f32 %v382_v5, %v382_v5 }
  0x14   :  { %v121_v6 = vsel %vm80_vm0, %v120_v2, 0.0  ;;  %v81_v7 = vsel %vm80_vm0, %v79_v3, 0.0 }
  0x15   :  { %122 = vadd.xlane.f32.xlu1 %v121_v6  ;;  %82 = vadd.xlane.f32.xlu0 %v81_v7  ;;  %v99_v10 = vsel %vm80_vm0, %v98_v8, 0.0  ;;  %v148_v11 = vsel %vm80_vm0, %v146_v9, 0.0 }
  0x1d   :  { %100 = vadd.xlane.f32.xlu1 %v99_v10  ;;  %149 = vadd.xlane.f32.xlu0 %v148_v11 }
  0x88   :  { %v123_v12 = vpop.xlane.xlu1 %122  ;;  %v83_v13 = vpop.xlane.xlu0 %82 }
  0x89   :  { %v124_v14 = vmax.f32 %v123_v12, 1e-16  ;;  %v84_v15 = vmax.f32 %v83_v13, 1e-16 }
  0x8b   :  { %223 = vrsqrt.f32 %v124_v14  ;;  %vm131_vm1 = vweird.f32 %v124_v14  ;;  %vm91_vm5 = vweird.f32 %v84_v15 }
  0x8c   :  { %225 = vrsqrt.f32 %v84_v15 }
  0x90   :  { %v101_v16 = vpop.xlane.xlu1 %100  ;;  %v150_v17 = vpop.xlane.xlu0 %149 }
  0x91   :  { %v224_v18 = vpop.eup %223  ;;  %v102_v19 = vmax.f32 %v101_v16, 1e-16  ;;  %v151_v20 = vmax.f32 %v150_v17, 1e-16 }
  0x92   :  { %v226_v21 = vpop.eup %225  ;;  %v126_v22 = vmul.f32 %v224_v18, %v124_v14  ;;  %vm132_vm2 = vweird.f32 %v224_v18 }
  0x93   :  { %v86_v23 = vmul.f32 %v226_v21, %v84_v15  ;;  %227 = vrsqrt.f32 %v102_v19  ;;  %vm392_vm3 = vmor %vm131_vm1, %vm132_vm2  ;;  %vm92_vm4 = vweird.f32 %v226_v21  ;;  %vm109_vm7 = vweird.f32 %v102_v19 }
  0x94   :  { %v127_v24 = vmul.f32 %v224_v18, %v126_v22  ;;  %229 = vrsqrt.f32 %v151_v20  ;;  %vm93_vm6 = vmor %vm91_vm5, %vm92_vm4  ;;  %vm158_vm11 = vweird.f32 %v151_v20 }
  0x95   :  { %v87_v25 = vmul.f32 %v226_v21, %v86_v23 }
  0x96   :  { %v128_v26 = vmul.f32 0.5, %v127_v24 }
  0x97   :  { %v88_v27 = vmul.f32 0.5, %v87_v25 }
  0x98   :  { %v129_v28 = vsub.f32 1.5, %v128_v26 }
  0x99   :  { %v228_v29 = vpop.eup %227  ;;  %v89_v31 = vsub.f32 1.5, %v88_v27 }
  0x9a   :  { %v230_v32 = vpop.eup %229  ;;  %v104_v33 = vmul.f32 %v228_v29, %v102_v19  ;;  %v130_v34 = vmul.f32 %v224_v18, %v129_v28  ;;  %vm110_vm8 = vweird.f32 %v228_v29 }
  0x9b   :  { %v90_v35 = vmul.f32 %v226_v21, %v89_v31  ;;  %v153_v36 = vmul.f32 %v230_v32, %v151_v20  ;;  %vm111_vm9 = vmor %vm109_vm7, %vm110_vm8  ;;  %vm159_vm10 = vweird.f32 %v230_v32 }
  0x9c   :  { %v105_v37 = vmul.f32 %v228_v29, %v104_v33  ;;  %v134_v38 = vsel %vm392_vm3, %v224_v18, %v130_v34  ;;  %vm160_vm12 = vmor %vm158_vm11, %vm159_vm10 }
  0x9d   :  { %v94_v39 = vsel %vm93_vm6, %v226_v21, %v90_v35  ;;  %v154_v40 = vmul.f32 %v230_v32, %v153_v36  ;;  %v135_v43 = vmul.f32 %v134_v38, %v78_v0 }
  0x9e   :  { %v106_v41 = vmul.f32 0.5, %v105_v37  ;;  %v95_v42 = vmul.f32 2.0, %v94_v39 }
  0x9f   :  { %v155_v44 = vmul.f32 0.5, %v154_v40 }
  0xa0   :  { %v107_v45 = vsub.f32 1.5, %v106_v41  ;;  %v96_v46 = vmul.f32 %v95_v42, %v76_v1 }
  0xa1   :  { %v156_v47 = vsub.f32 1.5, %v155_v44 }
  0xa2   :  { %v108_v48 = vmul.f32 %v228_v29, %v107_v45  ;;  %v136_v49 = vmul.f32 %v135_v43, %v96_v46  ;;  %97 = vst.msk [vmem:[#allocation2] sm:$0xff] %vm80_vm0, %v96_v46 }
  0xa3   :  { %v157_v50 = vmul.f32 %v230_v32, %v156_v47 }
  0xa4   :  { %v137_v51 = vsel %vm80_vm0, %v136_v49, 0.0  ;;  %v112_v52 = vsel %vm111_vm9, %v228_v29, %v108_v48 }
  0xa5   :  { %138 = vadd.xlane.f32.xlu2 %v137_v51  ;;  %v161_v53 = vsel %vm160_vm12, %v230_v32, %v157_v50  ;;  %v113_v54 = vmul.f32 %v112_v52, %v380_v4 }
  0xa6   :  { %v162_v55 = vmul.f32 %v161_v53, %v382_v5 }
  0xa7   :  { %v114_v56 = vmul.f32 %v113_v54, %v96_v46 }
  0xa8   :  { %217 = vmatpush.xpose.msk.msra.mxu0 %vm80_vm0, %v162_v55 }
  0xa9   :  { %v115_v57 = vsel %vm80_vm0, %v114_v56, 0.0  ;;  %v163_v58 = vld [vmem:[#allocation2] sm:$0xff] }
  0xaa   :  { %116 = vadd.xlane.f32.xlu0 %v115_v57 }
  0xab   :  { %218 = vmatmul.msk.f32.vlgmr.msra.gmra.mxu0 %vm80_vm0, %v163_v58 }
 0x118   :  { %v139_v59 = vpop.xlane.xlu2 %138 }
 0x119   :  { %v140_v60 = vmul.f32 1.442695, %v139_v59 }
 0x11b   :  { %231 = vpow2.f32 %v140_v60 }
 0x11d   :  { %v117_v61 = vpop.xlane.xlu0 %116 }
 0x11e   :  { %119 = vst.msk [vmem:[#allocation3] sm:$0xff] %vm118_vm13, %v117_v61 }
 0x121   :  { %v232_v62 = vpop.eup %231 }
 0x122   :  { %v143_v63 = vsub.f32 0.0, %v232_v62 }
 0x124   :  { %144 = vst.msk [vmem:[#allocation4] sm:$0xff] %vm118_vm13, %v143_v63 }
 0x125   :  { %v206_v10 = vld [vmem:[#allocation3] sm:$0xff] }
 0x128   :  { %v187_v0 = vpop.f32.mrf.mxu0 }
 0x129   :  { %v191_v1 = vmul.f32 1.442695, %v187_v0 }
 0x12b   :  { %233 = vpow2.f32 %v191_v1  ;;  %v190_v4 = vld [vmem:[#allocation4] sm:$0xff] }
 0x131   :  { %v234_v2 = vpop.eup %233 }
 0x132   :  { %v194_v3 = vsel %vm193_vm14, %v234_v2, 0.0 }
 0x133   :  { %195 = vadd.xlane.f32.xlu2 %v194_v3 }
 0x1a6   :  { %v196_v5 = vpop.xlane.xlu2 %195 }
 0x1a7   :  { %v197_v6 = vadd.f32 %v196_v5, %v190_v4 }
 0x1a9   :  { %199 = vst.msk [vmem:[#allocation4] sm:$0xff] %vm118_vm13, %v197_v6 }
 0x1b0   :  { %v203_v7 = vld [vmem:[#allocation4] sm:$0xff] }
 0x1b1   :  { %235 = vlog2.f32 %v203_v7 }
 0x1b7   :  { %v236_v8 = vpop.eup %235 }
 0x1b8   :  { %v205_v9 = vmul.f32 0.6931472, %v236_v8 }
 0x1ba   :  { %v207_v11 = vsub.f32 %v205_v9, %v206_v10 }
 0x1bc   :  { %v208_v12 = vmul.f32 0.4342945, %v207_v11 }
 0x1be   :  { %209 = vst.msk [vmem:[%s416_s4] sm:$0xff] %vm118_vm13, %v208_v12 }
 0x1bf   :  { %214 = vsyncpa [#allocation6], 1 }
 0x1c0   :  { %215 = vsyncpa [#allocation8], 1 }
 0x1c1   :  { %216 = vsyncpa [#allocation11], 1 }

</bundles_post_ra>
